<compile_context>
chip_gen: v7x
topology: tpu7x:2x2x1
jax: 0.10.0
libtpu: 0.0.40
codegen_flags: <defaults>
</compile_context>

<pallas_src>
import jax
import jax.numpy as jnp
from jax.experimental import pallas as pl
from jax.experimental.pallas import tpu as pltpu

HIDDENS = 256
LN_EPS = 1e-5
LEAKY_SLOPE = 0.01   # nn.LeakyReLU default negative_slope
MAX_TM = 1024        # largest batch tile (VMEM-safe on v5e..v7x)
MIN_TM = 16          # bf16 x tile -> 16-row sublane granularity


def _round_up(x, m):
    return ((x + m - 1) // m) * m


def _cdiv(a, b):
    return -(-a // b)


def _layernorm(h, gamma, beta):
    # Two independent reductions (shorter XLU dependency chain than the
    # centered formulation); biased variance like torch.nn.LayerNorm.
    mean = jnp.mean(h, axis=-1, keepdims=True)
    mean_sq = jnp.mean(h * h, axis=-1, keepdims=True)
    var = mean_sq - mean * mean
    inv = jax.lax.rsqrt(var + LN_EPS)
    return (h - mean) * inv * gamma + beta


def _leaky_relu(h):
    return jnp.where(h >= 0, h, LEAKY_SLOPE * h)


def qnet_kernel(x_ref,
                w1_ref, b1_ref, g1_ref, be1_ref,
                w2_ref, b2_ref, g2_ref, be2_ref,
                w3_ref, b3_ref, g3_ref, be3_ref,
                w4_ref, b4_ref,
                out_ref):
    # x and the weights are bf16 (MXU-rate operands); everything elementwise
    # (bias add, LayerNorm, LeakyReLU) runs in f32.
    h = jnp.dot(x_ref[...], w1_ref[...],
                preferred_element_type=jnp.float32) + b1_ref[...]
    h = _leaky_relu(_layernorm(h, g1_ref[...], be1_ref[...]))

    h = jnp.dot(h.astype(jnp.bfloat16), w2_ref[...],
                preferred_element_type=jnp.float32) + b2_ref[...]
    h = _leaky_relu(_layernorm(h, g2_ref[...], be2_ref[...]))

    h = jnp.dot(h.astype(jnp.bfloat16), w3_ref[...],
                preferred_element_type=jnp.float32) + b3_ref[...]
    h = _leaky_relu(_layernorm(h, g3_ref[...], be3_ref[...]))

    q = jnp.dot(h.astype(jnp.bfloat16), w4_ref[...],
                preferred_element_type=jnp.float32) + b4_ref[...]
    out_ref[...] = q.astype(out_ref.dtype)


def init_qnet_params(key, n_features, n_actions):
    """Deterministic init mimicking PyTorch nn.Linear / nn.LayerNorm defaults."""
    hs = HIDDENS
    dims = [(n_features, hs), (hs, hs), (hs, hs), (hs, n_actions)]
    params = {}
    for li, (fan_in, fan_out) in enumerate(dims, start=1):
        key, kw, kb = jax.random.split(key, 3)
        bound = 1.0 / jnp.sqrt(jnp.float32(fan_in))
        params[f"w{li}"] = jax.random.uniform(
            kw, (fan_in, fan_out), jnp.float32, -bound, bound)
        params[f"b{li}"] = jax.random.uniform(
            kb, (1, fan_out), jnp.float32, -bound, bound)
    for li in (1, 2, 3):
        params[f"g{li}"] = jnp.ones((1, hs), jnp.float32)
        params[f"be{li}"] = jnp.zeros((1, hs), jnp.float32)
    return params


def _pick_tile(B):
    """Batch tile: single step for tiny batches, otherwise >= 2 (even) steps of
    up to MAX_TM rows so v7x's two TensorCores both get work."""
    if B <= MIN_TM:
        return MIN_TM
    nsteps = max(2, _cdiv(B, MAX_TM))
    nsteps += nsteps % 2          # even step count -> balanced across 2 TCs
    return _round_up(_cdiv(B, nsteps), MIN_TM)


def qnet_forward(x, params, n_actions):
    """x: (B, n_features) float32 (caller flattens 3-D inputs, as QNet.forward does)."""
    B, F = x.shape

    tm = _pick_tile(B)
    B_pad = _round_up(B, tm)

    # One pass over x: cast to bf16 (halves DMA bytes) and pad only the batch
    # dim when needed.  The feature dim is NOT padded: the x block's last dim
    # equals the full array dim, which is legal even when F % 128 != 0.
    x_bf = x.astype(jnp.bfloat16)
    if B_pad != B:
        x_bf = jnp.pad(x_bf, ((0, B_pad - B), (0, 0)))

    bf = lambda w: w.astype(jnp.bfloat16)
    ordered = [
        bf(params["w1"]), params["b1"], params["g1"], params["be1"],
        bf(params["w2"]), params["b2"], params["g2"], params["be2"],
        bf(params["w3"]), params["b3"], params["g3"], params["be3"],
        bf(params["w4"]), params["b4"],
    ]

    in_specs = [pl.BlockSpec((tm, F), lambda i: (i, 0))]
    # Weights / biases / LN params are grid-invariant (constant index_map), so
    # Pallas keeps them resident across grid steps (no re-DMA per step).
    for p in ordered:
        in_specs.append(pl.BlockSpec(p.shape, lambda i: (0, 0)))

    out = pl.pallas_call(
        qnet_kernel,
        out_shape=jax.ShapeDtypeStruct((B_pad, n_actions), jnp.float32),
        grid_spec=pltpu.PrefetchScalarGridSpec(
            num_scalar_prefetch=0,
            grid=(B_pad // tm,),
            in_specs=in_specs,
            # Native-width output (last block dim == full array dim): masked
            # 16-lane stores are cheaper than an 8x padded slab + slice pass.
            out_specs=pl.BlockSpec((tm, n_actions), lambda i: (i, 0)),
        ),
        compiler_params=pltpu.CompilerParams(
            dimension_semantics=("parallel",)),
    )(x_bf, *ordered)

    return out if B_pad == B else out[:B]


def qnet_forward_ref(x, params):
    """Pure-JAX f32 reference matching the PyTorch module."""
    def ln(h, g, b):
        mean = jnp.mean(h, axis=-1, keepdims=True)
        var = jnp.mean((h - mean) ** 2, axis=-1, keepdims=True)
        return (h - mean) * jax.lax.rsqrt(var + LN_EPS) * g + b

    h = x @ params["w1"] + params["b1"]
    h = _leaky_relu(ln(h, params["g1"], params["be1"]))
    h = h @ params["w2"] + params["b2"]
    h = _leaky_relu(ln(h, params["g2"], params["be2"]))
    h = h @ params["w3"] + params["b3"]
    h = _leaky_relu(ln(h, params["g3"], params["be3"]))
    return h @ params["w4"] + params["b4"]


if __name__ == "__main__":
    key = jax.random.PRNGKey(0)
    n_features, n_actions, batch = 64, 16, 8

    kp, kx = jax.random.split(key)
    params = init_qnet_params(kp, n_features, n_actions)

    # QNet.forward flattens 3-D (B, a, b) inputs to (B, a*b); emulate that glue.
    # TODO(synk): the numpy->tensor conversion / device placement / epsilon-greedy
    # get_action() glue is host-side Python, not part of the fused forward kernel.
    x3 = jax.random.normal(kx, (batch, 8, n_features // 8), jnp.float32)
    x = x3.reshape(batch, -1)

    q = jax.block_until_ready(qnet_forward(x, params, n_actions))
    q_ref = qnet_forward_ref(x, params)
    assert q.shape == (batch, n_actions)
    err = float(jnp.max(jnp.abs(q - q_ref)))
    # Tolerance loosened vs. the f32 reference because matmul operands are bf16.
    assert jnp.allclose(q, q_ref, atol=5e-2, rtol=5e-2), err

    # Larger batch exercising the multi-step (>=2, even) grid path + batch pad.
    xb = jax.random.normal(jax.random.PRNGKey(1), (600, n_features), jnp.float32)
    qb = jax.block_until_ready(qnet_forward(xb, params, n_actions))
    qb_ref = qnet_forward_ref(xb, params)
    assert qb.shape == (600, n_actions)
    errb = float(jnp.max(jnp.abs(qb - qb_ref)))
    assert jnp.allclose(qb, qb_ref, atol=5e-2, rtol=5e-2), errb

    print("KERNEL_OK")
</pallas_src>

<mosaic_0001>
module attributes {stable_mosaic.version = 11 : i64} {
  func.func @qnet_kernel(%arg0: i32, %arg1: memref<16x64xbf16, #tpu.memory_space<vmem>>, %arg2: memref<64x256xbf16, #tpu.memory_space<vmem>>, %arg3: memref<1x256xf32, #tpu.memory_space<vmem>>, %arg4: memref<1x256xf32, #tpu.memory_space<vmem>>, %arg5: memref<1x256xf32, #tpu.memory_space<vmem>>, %arg6: memref<256x256xbf16, #tpu.memory_space<vmem>>, %arg7: memref<1x256xf32, #tpu.memory_space<vmem>>, %arg8: memref<1x256xf32, #tpu.memory_space<vmem>>, %arg9: memref<1x256xf32, #tpu.memory_space<vmem>>, %arg10: memref<256x256xbf16, #tpu.memory_space<vmem>>, %arg11: memref<1x256xf32, #tpu.memory_space<vmem>>, %arg12: memref<1x256xf32, #tpu.memory_space<vmem>>, %arg13: memref<1x256xf32, #tpu.memory_space<vmem>>, %arg14: memref<256x16xbf16, #tpu.memory_space<vmem>>, %arg15: memref<1x16xf32, #tpu.memory_space<vmem>>, %arg16: memref<16x16xf32, #tpu.memory_space<vmem>>) attributes {dimension_semantics = [#tpu.dimension_semantics<parallel>], iteration_bounds = array<i64: 1>, scalar_prefetch = 0 : i64, scratch_operands = 0 : i64, tpu.core_type = #tpu.core_type<tc>, window_params = [{transform_indices = @transform_0, window_bounds = array<i64: 16, 64>}, {pipeline_mode = #tpu.pipeline_mode<synchronous>, transform_indices = @transform_1, window_bounds = array<i64: 64, 256>}, {pipeline_mode = #tpu.pipeline_mode<synchronous>, transform_indices = @transform_2, window_bounds = array<i64: 1, 256>}, {pipeline_mode = #tpu.pipeline_mode<synchronous>, transform_indices = @transform_3, window_bounds = array<i64: 1, 256>}, {pipeline_mode = #tpu.pipeline_mode<synchronous>, transform_indices = @transform_4, window_bounds = array<i64: 1, 256>}, {pipeline_mode = #tpu.pipeline_mode<synchronous>, transform_indices = @transform_5, window_bounds = array<i64: 256, 256>}, {pipeline_mode = #tpu.pipeline_mode<synchronous>, transform_indices = @transform_6, window_bounds = array<i64: 1, 256>}, {pipeline_mode = #tpu.pipeline_mode<synchronous>, transform_indices = @transform_7, window_bounds = array<i64: 1, 256>}, {pipeline_mode = #tpu.pipeline_mode<synchronous>, transform_indices = @transform_8, window_bounds = array<i64: 1, 256>}, {pipeline_mode = #tpu.pipeline_mode<synchronous>, transform_indices = @transform_9, window_bounds = array<i64: 256, 256>}, {pipeline_mode = #tpu.pipeline_mode<synchronous>, transform_indices = @transform_10, window_bounds = array<i64: 1, 256>}, {pipeline_mode = #tpu.pipeline_mode<synchronous>, transform_indices = @transform_11, window_bounds = array<i64: 1, 256>}, {pipeline_mode = #tpu.pipeline_mode<synchronous>, transform_indices = @transform_12, window_bounds = array<i64: 1, 256>}, {pipeline_mode = #tpu.pipeline_mode<synchronous>, transform_indices = @transform_13, window_bounds = array<i64: 256, 16>}, {pipeline_mode = #tpu.pipeline_mode<synchronous>, transform_indices = @transform_14, window_bounds = array<i64: 1, 16>}, {transform_indices = @transform_15, window_bounds = array<i64: 16, 16>}]} {
    %c0 = arith.constant 0 : index
    %c0_0 = arith.constant 0 : index
    %0 = vector.load %arg1[%c0, %c0_0] : memref<16x64xbf16, #tpu.memory_space<vmem>>, vector<16x64xbf16>
    %c0_1 = arith.constant 0 : index
    %c0_2 = arith.constant 0 : index
    %1 = vector.load %arg2[%c0_1, %c0_2] : memref<64x256xbf16, #tpu.memory_space<vmem>>, vector<64x256xbf16>
    %cst = arith.constant dense<0.000000e+00> : vector<16x256xf32>
    %2 = tpu.matmul %0, %1, %cst {dimension_numbers = #tpu.dot_dimension_numbers<[1], [0], [0], [1], [0, 0, 1, 1], [], []>} : vector<16x64xbf16>, vector<64x256xbf16>, vector<16x256xf32> -> vector<16x256xf32>
    %c0_3 = arith.constant 0 : index
    %c0_4 = arith.constant 0 : index
    %3 = vector.load %arg3[%c0_3, %c0_4] : memref<1x256xf32, #tpu.memory_space<vmem>>, vector<1x256xf32>
    %4 = vector.broadcast %3 : vector<1x256xf32> to vector<16x256xf32>
    %5 = arith.addf %2, %4 : vector<16x256xf32>
    %c0_5 = arith.constant 0 : index
    %c0_6 = arith.constant 0 : index
    %6 = vector.load %arg4[%c0_5, %c0_6] : memref<1x256xf32, #tpu.memory_space<vmem>>, vector<1x256xf32>
    %c0_7 = arith.constant 0 : index
    %c0_8 = arith.constant 0 : index
    %7 = vector.load %arg5[%c0_7, %c0_8] : memref<1x256xf32, #tpu.memory_space<vmem>>, vector<1x256xf32>
    %cst_9 = arith.constant dense<0.000000e+00> : vector<16xf32>
    %8 = vector.multi_reduction <add>, %5, %cst_9 [1] : vector<16x256xf32> to vector<16xf32>
    %9 = vector.shape_cast %8 : vector<16xf32> to vector<16x1xf32>
    %cst_10 = arith.constant 2.560000e+02 : f32
    %10 = vector.broadcast %cst_10 : f32 to vector<16x1xf32>
    %11 = arith.divf %9, %10 : vector<16x1xf32>
    %12 = arith.mulf %5, %5 : vector<16x256xf32>
    %cst_11 = arith.constant dense<0.000000e+00> : vector<16xf32>
    %13 = vector.multi_reduction <add>, %12, %cst_11 [1] : vector<16x256xf32> to vector<16xf32>
    %14 = vector.shape_cast %13 : vector<16xf32> to vector<16x1xf32>
    %cst_12 = arith.constant 2.560000e+02 : f32
    %15 = vector.broadcast %cst_12 : f32 to vector<16x1xf32>
    %16 = arith.divf %14, %15 : vector<16x1xf32>
    %17 = arith.mulf %11, %11 : vector<16x1xf32>
    %18 = arith.subf %16, %17 : vector<16x1xf32>
    %cst_13 = arith.constant 9.99999974E-6 : f32
    %19 = vector.broadcast %cst_13 : f32 to vector<16x1xf32>
    %20 = arith.addf %18, %19 : vector<16x1xf32>
    %21 = math.rsqrt %20 : vector<16x1xf32>
    %22 = vector.broadcast %11 : vector<16x1xf32> to vector<16x256xf32>
    %23 = arith.subf %5, %22 : vector<16x256xf32>
    %24 = vector.broadcast %21 : vector<16x1xf32> to vector<16x256xf32>
    %25 = arith.mulf %23, %24 : vector<16x256xf32>
    %26 = vector.broadcast %6 : vector<1x256xf32> to vector<16x256xf32>
    %27 = arith.mulf %25, %26 : vector<16x256xf32>
    %28 = vector.broadcast %7 : vector<1x256xf32> to vector<16x256xf32>
    %29 = arith.addf %27, %28 : vector<16x256xf32>
    %cst_14 = arith.constant 0.000000e+00 : f32
    %30 = vector.broadcast %cst_14 : f32 to vector<16x256xf32>
    %31 = arith.cmpf oge, %29, %30 : vector<16x256xf32>
    %cst_15 = arith.constant 0.00999999977 : f32
    %32 = vector.broadcast %cst_15 : f32 to vector<16x256xf32>
    %33 = arith.mulf %32, %29 : vector<16x256xf32>
    %34 = arith.select %31, %29, %33 : vector<16x256xi1>, vector<16x256xf32>
    %35 = arith.truncf %34 : vector<16x256xf32> to vector<16x256xbf16>
    %c0_16 = arith.constant 0 : index
    %c0_17 = arith.constant 0 : index
    %36 = vector.load %arg6[%c0_16, %c0_17] : memref<256x256xbf16, #tpu.memory_space<vmem>>, vector<256x256xbf16>
    %cst_18 = arith.constant dense<0.000000e+00> : vector<16x256xf32>
    %37 = tpu.matmul %35, %36, %cst_18 {dimension_numbers = #tpu.dot_dimension_numbers<[1], [0], [0], [1], [0, 0, 1, 1], [], []>} : vector<16x256xbf16>, vector<256x256xbf16>, vector<16x256xf32> -> vector<16x256xf32>
    %c0_19 = arith.constant 0 : index
    %c0_20 = arith.constant 0 : index
    %38 = vector.load %arg7[%c0_19, %c0_20] : memref<1x256xf32, #tpu.memory_space<vmem>>, vector<1x256xf32>
    %39 = vector.broadcast %38 : vector<1x256xf32> to vector<16x256xf32>
    %40 = arith.addf %37, %39 : vector<16x256xf32>
    %c0_21 = arith.constant 0 : index
    %c0_22 = arith.constant 0 : index
    %41 = vector.load %arg8[%c0_21, %c0_22] : memref<1x256xf32, #tpu.memory_space<vmem>>, vector<1x256xf32>
    %c0_23 = arith.constant 0 : index
    %c0_24 = arith.constant 0 : index
    %42 = vector.load %arg9[%c0_23, %c0_24] : memref<1x256xf32, #tpu.memory_space<vmem>>, vector<1x256xf32>
    %cst_25 = arith.constant dense<0.000000e+00> : vector<16xf32>
    %43 = vector.multi_reduction <add>, %40, %cst_25 [1] : vector<16x256xf32> to vector<16xf32>
    %44 = vector.shape_cast %43 : vector<16xf32> to vector<16x1xf32>
    %cst_26 = arith.constant 2.560000e+02 : f32
    %45 = vector.broadcast %cst_26 : f32 to vector<16x1xf32>
    %46 = arith.divf %44, %45 : vector<16x1xf32>
    %47 = arith.mulf %40, %40 : vector<16x256xf32>
    %cst_27 = arith.constant dense<0.000000e+00> : vector<16xf32>
    %48 = vector.multi_reduction <add>, %47, %cst_27 [1] : vector<16x256xf32> to vector<16xf32>
    %49 = vector.shape_cast %48 : vector<16xf32> to vector<16x1xf32>
    %cst_28 = arith.constant 2.560000e+02 : f32
    %50 = vector.broadcast %cst_28 : f32 to vector<16x1xf32>
    %51 = arith.divf %49, %50 : vector<16x1xf32>
    %52 = arith.mulf %46, %46 : vector<16x1xf32>
    %53 = arith.subf %51, %52 : vector<16x1xf32>
    %cst_29 = arith.constant 9.99999974E-6 : f32
    %54 = vector.broadcast %cst_29 : f32 to vector<16x1xf32>
    %55 = arith.addf %53, %54 : vector<16x1xf32>
    %56 = math.rsqrt %55 : vector<16x1xf32>
    %57 = vector.broadcast %46 : vector<16x1xf32> to vector<16x256xf32>
    %58 = arith.subf %40, %57 : vector<16x256xf32>
    %59 = vector.broadcast %56 : vector<16x1xf32> to vector<16x256xf32>
    %60 = arith.mulf %58, %59 : vector<16x256xf32>
    %61 = vector.broadcast %41 : vector<1x256xf32> to vector<16x256xf32>
    %62 = arith.mulf %60, %61 : vector<16x256xf32>
    %63 = vector.broadcast %42 : vector<1x256xf32> to vector<16x256xf32>
    %64 = arith.addf %62, %63 : vector<16x256xf32>
    %cst_30 = arith.constant 0.000000e+00 : f32
    %65 = vector.broadcast %cst_30 : f32 to vector<16x256xf32>
    %66 = arith.cmpf oge, %64, %65 : vector<16x256xf32>
    %cst_31 = arith.constant 0.00999999977 : f32
    %67 = vector.broadcast %cst_31 : f32 to vector<16x256xf32>
    %68 = arith.mulf %67, %64 : vector<16x256xf32>
    %69 = arith.select %66, %64, %68 : vector<16x256xi1>, vector<16x256xf32>
    %70 = arith.truncf %69 : vector<16x256xf32> to vector<16x256xbf16>
    %c0_32 = arith.constant 0 : index
    %c0_33 = arith.constant 0 : index
    %71 = vector.load %arg10[%c0_32, %c0_33] : memref<256x256xbf16, #tpu.memory_space<vmem>>, vector<256x256xbf16>
    %cst_34 = arith.constant dense<0.000000e+00> : vector<16x256xf32>
    %72 = tpu.matmul %70, %71, %cst_34 {dimension_numbers = #tpu.dot_dimension_numbers<[1], [0], [0], [1], [0, 0, 1, 1], [], []>} : vector<16x256xbf16>, vector<256x256xbf16>, vector<16x256xf32> -> vector<16x256xf32>
    %c0_35 = arith.constant 0 : index
    %c0_36 = arith.constant 0 : index
    %73 = vector.load %arg11[%c0_35, %c0_36] : memref<1x256xf32, #tpu.memory_space<vmem>>, vector<1x256xf32>
    %74 = vector.broadcast %73 : vector<1x256xf32> to vector<16x256xf32>
    %75 = arith.addf %72, %74 : vector<16x256xf32>
    %c0_37 = arith.constant 0 : index
    %c0_38 = arith.constant 0 : index
    %76 = vector.load %arg12[%c0_37, %c0_38] : memref<1x256xf32, #tpu.memory_space<vmem>>, vector<1x256xf32>
    %c0_39 = arith.constant 0 : index
    %c0_40 = arith.constant 0 : index
    %77 = vector.load %arg13[%c0_39, %c0_40] : memref<1x256xf32, #tpu.memory_space<vmem>>, vector<1x256xf32>
    %cst_41 = arith.constant dense<0.000000e+00> : vector<16xf32>
    %78 = vector.multi_reduction <add>, %75, %cst_41 [1] : vector<16x256xf32> to vector<16xf32>
    %79 = vector.shape_cast %78 : vector<16xf32> to vector<16x1xf32>
    %cst_42 = arith.constant 2.560000e+02 : f32
    %80 = vector.broadcast %cst_42 : f32 to vector<16x1xf32>
    %81 = arith.divf %79, %80 : vector<16x1xf32>
    %82 = arith.mulf %75, %75 : vector<16x256xf32>
    %cst_43 = arith.constant dense<0.000000e+00> : vector<16xf32>
    %83 = vector.multi_reduction <add>, %82, %cst_43 [1] : vector<16x256xf32> to vector<16xf32>
    %84 = vector.shape_cast %83 : vector<16xf32> to vector<16x1xf32>
    %cst_44 = arith.constant 2.560000e+02 : f32
    %85 = vector.broadcast %cst_44 : f32 to vector<16x1xf32>
    %86 = arith.divf %84, %85 : vector<16x1xf32>
    %87 = arith.mulf %81, %81 : vector<16x1xf32>
    %88 = arith.subf %86, %87 : vector<16x1xf32>
    %cst_45 = arith.constant 9.99999974E-6 : f32
    %89 = vector.broadcast %cst_45 : f32 to vector<16x1xf32>
    %90 = arith.addf %88, %89 : vector<16x1xf32>
    %91 = math.rsqrt %90 : vector<16x1xf32>
    %92 = vector.broadcast %81 : vector<16x1xf32> to vector<16x256xf32>
    %93 = arith.subf %75, %92 : vector<16x256xf32>
    %94 = vector.broadcast %91 : vector<16x1xf32> to vector<16x256xf32>
    %95 = arith.mulf %93, %94 : vector<16x256xf32>
    %96 = vector.broadcast %76 : vector<1x256xf32> to vector<16x256xf32>
    %97 = arith.mulf %95, %96 : vector<16x256xf32>
    %98 = vector.broadcast %77 : vector<1x256xf32> to vector<16x256xf32>
    %99 = arith.addf %97, %98 : vector<16x256xf32>
    %cst_46 = arith.constant 0.000000e+00 : f32
    %100 = vector.broadcast %cst_46 : f32 to vector<16x256xf32>
    %101 = arith.cmpf oge, %99, %100 : vector<16x256xf32>
    %cst_47 = arith.constant 0.00999999977 : f32
    %102 = vector.broadcast %cst_47 : f32 to vector<16x256xf32>
    %103 = arith.mulf %102, %99 : vector<16x256xf32>
    %104 = arith.select %101, %99, %103 : vector<16x256xi1>, vector<16x256xf32>
    %105 = arith.truncf %104 : vector<16x256xf32> to vector<16x256xbf16>
    %c0_48 = arith.constant 0 : index
    %c0_49 = arith.constant 0 : index
    %106 = vector.load %arg14[%c0_48, %c0_49] : memref<256x16xbf16, #tpu.memory_space<vmem>>, vector<256x16xbf16>
    %cst_50 = arith.constant dense<0.000000e+00> : vector<16x16xf32>
    %107 = tpu.matmul %105, %106, %cst_50 {dimension_numbers = #tpu.dot_dimension_numbers<[1], [0], [0], [1], [0, 0, 1, 1], [], []>} : vector<16x256xbf16>, vector<256x16xbf16>, vector<16x16xf32> -> vector<16x16xf32>
    %c0_51 = arith.constant 0 : index
    %c0_52 = arith.constant 0 : index
    %108 = vector.load %arg15[%c0_51, %c0_52] : memref<1x16xf32, #tpu.memory_space<vmem>>, vector<1x16xf32>
    %109 = vector.broadcast %108 : vector<1x16xf32> to vector<16x16xf32>
    %110 = arith.addf %107, %109 : vector<16x16xf32>
    %c0_53 = arith.constant 0 : index
    %c0_54 = arith.constant 0 : index
    %111 = vector.load %arg16[%c0_53, %c0_54] : memref<16x16xf32, #tpu.memory_space<vmem>>, vector<16x16xf32>
    tpu.vector_store %arg16[%c0_53, %c0_54], %110 {strides = array<i32>} : memref<16x16xf32, #tpu.memory_space<vmem>>, vector<16x16xf32>,
    return
  }
  func.func @transform_0(%arg0: i32) -> (i32, i32) {
    %c0_i32 = arith.constant 0 : i32
    %c0_i32_0 = arith.constant 0 : i32
    return %arg0, %c0_i32 : i32, i32
  }
  func.func @transform_1(%arg0: i32) -> (i32, i32) {
    %c0_i32 = arith.constant 0 : i32
    %c0_i32_0 = arith.constant 0 : i32
    %c0_i32_1 = arith.constant 0 : i32
    return %c0_i32, %c0_i32_0 : i32, i32
  }
  func.func @transform_2(%arg0: i32) -> (i32, i32) {
    %c0_i32 = arith.constant 0 : i32
    %c0_i32_0 = arith.constant 0 : i32
    %c0_i32_1 = arith.constant 0 : i32
    return %c0_i32, %c0_i32_0 : i32, i32
  }
  func.func @transform_3(%arg0: i32) -> (i32, i32) {
    %c0_i32 = arith.constant 0 : i32
    %c0_i32_0 = arith.constant 0 : i32
    %c0_i32_1 = arith.constant 0 : i32
    return %c0_i32, %c0_i32_0 : i32, i32
  }
  func.func @transform_4(%arg0: i32) -> (i32, i32) {
    %c0_i32 = arith.constant 0 : i32
    %c0_i32_0 = arith.constant 0 : i32
    %c0_i32_1 = arith.constant 0 : i32
    return %c0_i32, %c0_i32_0 : i32, i32
  }
  func.func @transform_5(%arg0: i32) -> (i32, i32) {
    %c0_i32 = arith.constant 0 : i32
    %c0_i32_0 = arith.constant 0 : i32
    %c0_i32_1 = arith.constant 0 : i32
    return %c0_i32, %c0_i32_0 : i32, i32
  }
  func.func @transform_6(%arg0: i32) -> (i32, i32) {
    %c0_i32 = arith.constant 0 : i32
    %c0_i32_0 = arith.constant 0 : i32
    %c0_i32_1 = arith.constant 0 : i32
    return %c0_i32, %c0_i32_0 : i32, i32
  }
  func.func @transform_7(%arg0: i32) -> (i32, i32) {
    %c0_i32 = arith.constant 0 : i32
    %c0_i32_0 = arith.constant 0 : i32
    %c0_i32_1 = arith.constant 0 : i32
    return %c0_i32, %c0_i32_0 : i32, i32
  }
  func.func @transform_8(%arg0: i32) -> (i32, i32) {
    %c0_i32 = arith.constant 0 : i32
    %c0_i32_0 = arith.constant 0 : i32
    %c0_i32_1 = arith.constant 0 : i32
    return %c0_i32, %c0_i32_0 : i32, i32
  }
  func.func @transform_9(%arg0: i32) -> (i32, i32) {
    %c0_i32 = arith.constant 0 : i32
    %c0_i32_0 = arith.constant 0 : i32
    %c0_i32_1 = arith.constant 0 : i32
    return %c0_i32, %c0_i32_0 : i32, i32
  }
  func.func @transform_10(%arg0: i32) -> (i32, i32) {
    %c0_i32 = arith.constant 0 : i32
    %c0_i32_0 = arith.constant 0 : i32
    %c0_i32_1 = arith.constant 0 : i32
    return %c0_i32, %c0_i32_0 : i32, i32
  }
  func.func @transform_11(%arg0: i32) -> (i32, i32) {
    %c0_i32 = arith.constant 0 : i32
    %c0_i32_0 = arith.constant 0 : i32
    %c0_i32_1 = arith.constant 0 : i32
    return %c0_i32, %c0_i32_0 : i32, i32
  }
  func.func @transform_12(%arg0: i32) -> (i32, i32) {
    %c0_i32 = arith.constant 0 : i32
    %c0_i32_0 = arith.constant 0 : i32
    %c0_i32_1 = arith.constant 0 : i32
    return %c0_i32, %c0_i32_0 : i32, i32
  }
  func.func @transform_13(%arg0: i32) -> (i32, i32) {
    %c0_i32 = arith.constant 0 : i32
    %c0_i32_0 = arith.constant 0 : i32
    %c0_i32_1 = arith.constant 0 : i32
    return %c0_i32, %c0_i32_0 : i32, i32
  }
  func.func @transform_14(%arg0: i32) -> (i32, i32) {
    %c0_i32 = arith.constant 0 : i32
    %c0_i32_0 = arith.constant 0 : i32
    %c0_i32_1 = arith.constant 0 : i32
    return %c0_i32, %c0_i32_0 : i32, i32
  }
  func.func @transform_15(%arg0: i32) -> (i32, i32) {
    %c0_i32 = arith.constant 0 : i32
    %c0_i32_0 = arith.constant 0 : i32
    return %arg0, %c0_i32 : i32, i32
  }
}

</mosaic_0001>

<bundles_post_ra>
// kernel: tpu_custom_call.1
= control target key start
LH: loop header
LB: loop body
LE: loop exit
PB: predicated region body
PF: predicated region fallthrough
CT: control target
= control target key end

     0   :  { %20 = vsyncpa [#allocation3], 0  ;;  %s1790_s0 = inlined_call_operand.vmem [shape: bf16[16,64], index: 0, kind: input, shape index: {}]   ;;  %s1791_s1 = inlined_call_operand.vmem [shape: bf16[64,256], index: 1, kind: input, shape index: {}]   ;;  %s1792_s2 = inlined_call_operand.vmem [shape: f32[1,256], index: 2, kind: input, shape index: {}]   ;;  %s1793_s3 = inlined_call_operand.vmem [shape: f32[1,256], index: 3, kind: input, shape index: {}]   ;;  %s1794_s4 = inlined_call_operand.vmem [shape: f32[1,256], index: 4, kind: input, shape index: {}]   ;;  %s1795_s5 = inlined_call_operand.hbm [shape: bf16[256,256], index: 5, kind: input, shape index: {}]   ;;  %s1796_s6 = inlined_call_operand.vmem [shape: f32[1,256], index: 6, kind: input, shape index: {}]   ;;  %s1797_s7 = inlined_call_operand.vmem [shape: f32[1,256], index: 7, kind: input, shape index: {}]   ;;  %s1798_s8 = inlined_call_operand.vmem [shape: f32[1,256], index: 8, kind: input, shape index: {}]   ;;  %s1799_s9 = inlined_call_operand.hbm [shape: bf16[256,256], index: 9, kind: input, shape index: {}]   ;;  %s1800_s10 = inlined_call_operand.vmem [shape: f32[1,256], index: 10, kind: input, shape index: {}]   ;;  %s1801_s11 = inlined_call_operand.vmem [shape: f32[1,256], index: 11, kind: input, shape index: {}]   ;;  %s1802_s12 = inlined_call_operand.vmem [shape: f32[1,256], index: 12, kind: input, shape index: {}]   ;;  %s1803_s13 = inlined_call_operand.vmem [shape: bf16[256,16], index: 13, kind: input, shape index: {}]   ;;  %s1804_s14 = inlined_call_operand.vmem [shape: f32[1,16], index: 14, kind: input, shape index: {}]   ;;  %s1805_s15 = inlined_call_operand.hbm [shape: f32[16,16], index: 15, kind: output, shape index: {}]  }
   0x1   :  { %21 = vsyncpa [#allocation6], 0 }
   0x2   :  { %22 = vsyncpa [#allocation4], 0  ;;  %s1460_s18 = smov [#allocation2]   ;;  %s1388_s22 = scalar_lea.hbm %s1795_s5, 4096 }
   0x3   :  { %s38_s19 = sshll.u32 %s1460_s18, 4  ;;  %p1389_p0 = scmp.ne.s32.totalorder %s1795_s5, %s1388_s22  ;;  %s39_s19 = int_to_ptr.vmem [resolvable:$true] %s38_s19 }
   0x4   :  { %p1392_p1 = scmp.lt.u32.totalorder %s1388_s22, %s1795_s5 }
   0x6   :  { %p1394_p2 = pnand %p1392_p1, %p1389_p0 }
   0x8   :  { %1397 = shalt.err (!%p1394_p2)
}
   0x9   :  { %s1398_s27 = scalar_lea.vmem %s39_s19, 4096  ;;  %p1403_p4 = scmp.lt.s32.totalorder %s39_s19, %s39_s19 }
   0xa   :  { %p1399_p3 = scmp.ne.s32.totalorder %s39_s19, %s1398_s27  ;;  %p1404_p5 = scmp.lt.s32.totalorder %s1398_s27, %s1398_s27 }
   0xc   :  { %p1405_p6 = por %p1404_p5, %p1403_p4 }
   0xe   :  { %p1406_p7 = pnand %p1405_p6, %p1399_p3 }
  0x10   :  { %1409 = shalt.err (!%p1406_p7)
}
  0x11   :  { %s1461_s28 = smov 128   ;;  %s1462_s29 = smov 8  }
  0x12   :  { %44 = dma.hbm_to_vmem [thread:$0]  %s1795_s5, 4096, %s39_s19, [#allocation3], %s1461_s28, %s1461_s28, %s1462_s29  }
  0x13   :  { %s1463_s17 = smov [#allocation5]   ;;  %s1410_s22 = scalar_lea.hbm %s1799_s9, 4096 }
  0x14   :  { %s56_s18 = sshll.u32 %s1463_s17, 4  ;;  %p1411_p8 = scmp.ne.s32.totalorder %s1799_s9, %s1410_s22  ;;  %s57_s18 = int_to_ptr.vmem [resolvable:$true] %s56_s18 }
  0x15   :  { %p1414_p9 = scmp.lt.u32.totalorder %s1410_s22, %s1799_s9 }
  0x17   :  { %p1416_p10 = pnand %p1414_p9, %p1411_p8 }
  0x19   :  { %1419 = shalt.err (!%p1416_p10)
}
  0x1a   :  { %s1420_s27 = scalar_lea.vmem %s57_s18, 4096  ;;  %p1425_p12 = scmp.lt.s32.totalorder %s57_s18, %s57_s18 }
  0x1b   :  { %p1421_p11 = scmp.ne.s32.totalorder %s57_s18, %s1420_s27  ;;  %p1426_p13 = scmp.lt.s32.totalorder %s1420_s27, %s1420_s27 }
  0x1d   :  { %p1427_p0 = por %p1426_p13, %p1425_p12 }
  0x1f   :  { %p1428_p1 = pnand %p1427_p0, %p1421_p11 }
  0x21   :  { %1431 = shalt.err (!%p1428_p1)
}
  0x22   :  { %62 = dma.hbm_to_vmem [thread:$0]  %s1799_s9, 4096, %s57_s18, [#allocation6], %s1461_s28, %s1461_s28, %s1462_s29  }
  0x23   :  { %1454 = dma.done.wait [#allocation3], 4096  }
  0x24   :  { %1455 = vsyncadd [#allocation3], 4294963200 }
  0x25   :  { %1456 = dma.done.wait [#allocation6], 4096  }
  0x26   :  { %1457 = vsyncadd [#allocation6], 4294963200  ;;  %v1464_v0 = vmov 0   ;;  %v1251_v1 = vld [vmem:[%s1791_s1 + $0x4] ss:$8 sps:$4 sm:$0xff]   ;;  %vm147_vm0 = vcmask 523264   ;;  %v92_v25 = vlaneseq }
  0x27   :  { %183 = vmatprep.mubr.bf16.mxu0 %v1464_v0  ;;  %v1253_v2 = vld [vmem:[%s1791_s1] ss:$8 sps:$4 sm:$0xff]   ;;  %151 = vmatprep.subr.bf16.mxu0 %v1251_v1  ;;  %v1254_v3 = vld [vmem:[%s1791_s1 + $0x14] ss:$8 sps:$4 sm:$0xff]   ;;  %v1256_v4 = vld [vmem:[%s1791_s1 + $0x10] ss:$8 sps:$4 sm:$0xff]  }
  0x28   :  { %152 = vmatpush1.bf16.msra.mxu0 %v1253_v2  ;;  %v1257_v5 = vld [vmem:[%s1791_s1 + $0x24] ss:$8 sps:$4 sm:$0xff]   ;;  %v1259_v6 = vld [vmem:[%s1791_s1 + $0x20] ss:$8 sps:$4 sm:$0xff]   ;;  %v1260_v7 = vld [vmem:[%s1791_s1 + $0x34] ss:$8 sps:$4 sm:$0xff]  }
  0x29   :  { %153 = vmatprep.subr.bf16.mxu0 %v1254_v3  ;;  %v1262_v8 = vld [vmem:[%s1791_s1 + $0x30] ss:$8 sps:$4 sm:$0xff]   ;;  %v1263_v9 = vld [vmem:[%s1790_s0] sm:$0xff]   ;;  %v1267_v12 = vld [vmem:[#allocation2 + $0x14] ss:$8 sps:$4 sm:$0xff]   ;;  %v93_v26 = vshrl.u32 %v92_v25, 7 }
  0x2a   :  { %v1264_v10 = vld [vmem:[#allocation2 + $0x4] ss:$8 sps:$4 sm:$0xff]   ;;  %v1266_v11 = vld [vmem:[#allocation2] ss:$8 sps:$4 sm:$0xff]   ;;  %v1269_v13 = vld [vmem:[#allocation2 + $0x10] ss:$8 sps:$4 sm:$0xff]  }
  0x2b   :  { %481 = vmatprep.subr.bf16.mxu1 %v1264_v10  ;;  %v1270_v14 = vld [vmem:[#allocation2 + $0x24] ss:$8 sps:$4 sm:$0xff]   ;;  %v1272_v15 = vld [vmem:[#allocation2 + $0x20] ss:$8 sps:$4 sm:$0xff]   ;;  %v1273_v16 = vld [vmem:[#allocation2 + $0x34] ss:$8 sps:$4 sm:$0xff]  }
  0x2c   :  { %154 = vmatpush1.bf16.msra.mxu0 %v1256_v4  ;;  %482 = vmatpush1.bf16.msra.mxu1 %v1266_v11  ;;  %v1275_v17 = vld [vmem:[#allocation2 + $0x30] ss:$8 sps:$4 sm:$0xff]   ;;  %v1276_v18 = vld [vmem:[#allocation2 + $0x44] ss:$8 sps:$4 sm:$0xff]   ;;  %v1278_v19 = vld [vmem:[#allocation2 + $0x40] ss:$8 sps:$4 sm:$0xff]  }
  0x2d   :  { %155 = vmatprep.subr.bf16.mxu0 %v1257_v5  ;;  %483 = vmatprep.subr.bf16.mxu1 %v1267_v12  ;;  %v1279_v20 = vld [vmem:[#allocation2 + $0x54] ss:$8 sps:$4 sm:$0xff]   ;;  %v1281_v21 = vld [vmem:[#allocation2 + $0x50] ss:$8 sps:$4 sm:$0xff]   ;;  %v1282_v22 = vld [vmem:[#allocation2 + $0x64] ss:$8 sps:$4 sm:$0xff]  }
  0x2e   :  { %v1284_v23 = vld [vmem:[#allocation2 + $0x60] ss:$8 sps:$4 sm:$0xff]   ;;  %v1285_v24 = vld [vmem:[#allocation2 + $0x74] ss:$8 sps:$4 sm:$0xff]   ;;  %v1603_v27 = vsub.s32 0, %v93_v26  ;;  %v1608_v29 = vsub.s32 1, %v93_v26 }
  0x2f   :  { %v90_v28 = vld [vmem:[%s1792_s2] sm:$0x3]  ;;  %v1287_v48 = vld [vmem:[#allocation2 + $0x70] ss:$8 sps:$4 sm:$0xff]   ;;  %v1288_v49 = vld [vmem:[#allocation2 + $0x84] ss:$8 sps:$4 sm:$0xff]  }
  0x30   :  { %156 = vmatpush1.bf16.msra.mxu0 %v1259_v6  ;;  %484 = vmatpush1.bf16.msra.mxu1 %v1269_v13  ;;  %v95_v30 = vrot.slane %v90_v28, %v1603_v27  ;;  %v99_v31 = vrot.slane %v90_v28, %v1608_v29  ;;  %v1290_v50 = vld [vmem:[#allocation2 + $0x80] ss:$8 sps:$4 sm:$0xff]   ;;  %v1291_v51 = vld [vmem:[#allocation2 + $0x94] ss:$8 sps:$4 sm:$0xff]   ;;  %v1293_v52 = vld [vmem:[#allocation2 + $0x90] ss:$8 sps:$4 sm:$0xff]  }
  0x31   :  { %157 = vmatprep.subr.bf16.mxu0 %v1260_v7  ;;  %485 = vmatprep.subr.bf16.mxu1 %v1270_v14  ;;  %v1294_v53 = vld [vmem:[#allocation2 + $0xa4] ss:$8 sps:$4 sm:$0xff]   ;;  %v1296_v54 = vld [vmem:[#allocation2 + $0xa0] ss:$8 sps:$4 sm:$0xff]   ;;  %v1297_v55 = vld [vmem:[#allocation2 + $0xb4] ss:$8 sps:$4 sm:$0xff]  }
  0x32   :  { %v1299_v56 = vld [vmem:[#allocation2 + $0xb0] ss:$8 sps:$4 sm:$0xff]   ;;  %v1300_v57 = vld [vmem:[#allocation2 + $0xc4] ss:$8 sps:$4 sm:$0xff]   ;;  %v1302_v58 = vld [vmem:[#allocation2 + $0xc0] ss:$8 sps:$4 sm:$0xff]  }
  0x33   :  { %v1303_v59 = vld [vmem:[#allocation2 + $0xd4] ss:$8 sps:$4 sm:$0xff]   ;;  %v1305_v60 = vld [vmem:[#allocation2 + $0xd0] ss:$8 sps:$4 sm:$0xff]   ;;  %v1306_v61 = vld [vmem:[#allocation2 + $0xe4] ss:$8 sps:$4 sm:$0xff]  }
  0x34   :  { %158 = vmatpush1.bf16.msra.mxu0 %v1262_v8  ;;  %486 = vmatpush1.bf16.msra.mxu1 %v1272_v15  ;;  %v1308_v62 = vld [vmem:[#allocation2 + $0xe0] ss:$8 sps:$4 sm:$0xff]   ;;  %v1309_v63 = vld [vmem:[#allocation2 + $0xf4] ss:$8 sps:$4 sm:$0xff]   ;;  %v1311_v0 = vld [vmem:[#allocation2 + $0xf0] ss:$8 sps:$4 sm:$0xff]  }
  0x35   :  { %487 = vmatprep.subr.bf16.mxu1 %v1273_v16  ;;  %v194_v15 = vld [vmem:[%s1793_s3] sm:$0x3]  ;;  %vm1111_vm13 = vcmask 130048   ;;  %s1465_s1 = smov [#allocation7]  }
  0x36   :  { %s1119_s2 = sshll.u32 %s1465_s1, 4  ;;  %s1120_s2 = int_to_ptr.vmem [resolvable:$true] %s1119_s2 }
  0x37   :  { %1141 = vmatmul.mubr.msk.bf16.vlgmr.msra.gmra.mrb[0].mxu0 %vm147_vm0, %v1263_v9  ;;  %s1432_s20 = scalar_lea.vmem %s1120_s2, 256  ;;  %p1437_p3 = scmp.lt.s32.totalorder %s1120_s2, %s1120_s2 }
  0x38   :  { %488 = vmatpush1.bf16.msra.mxu1 %v1275_v17  ;;  %p1433_p2 = scmp.ne.s32.totalorder %s1120_s2, %s1432_s20  ;;  %p1438_p4 = scmp.lt.s32.totalorder %s1432_s20, %s1432_s20 }
  0x39   :  { %489 = vmatprep.subr.bf16.mxu1 %v1276_v18  ;;  %v195_v18 = vld [vmem:[%s1794_s4] sm:$0x3] }
  0x3a   :  { %v256_v25 = vrot.slane %v195_v18, %v1608_v29  ;;  %p1439_p5 = por %p1438_p4, %p1437_p3 }
  0x3c   :  { %490 = vmatpush1.bf16.msra.mxu1 %v1278_v19  ;;  %v237_v19 = vrot.slane %v194_v15, %v1603_v27  ;;  %p1440_p6 = pnand %p1439_p5, %p1433_p2 }
  0x3d   :  { %491 = vmatprep.subr.bf16.mxu1 %v1279_v20  ;;  %v241_v20 = vrot.slane %v194_v15, %v1608_v29 }
  0x40   :  { %492 = vmatpush1.bf16.msra.mxu1 %v1281_v21 }
  0x41   :  { %493 = vmatprep.subr.bf16.mxu1 %v1282_v22 }
  0x44   :  { %494 = vmatpush1.bf16.msra.mxu1 %v1284_v23 }
  0x45   :  { %495 = vmatprep.subr.bf16.mxu1 %v1285_v24  ;;  %v252_v24 = vrot.slane %v195_v18, %v1603_v27 }
  0x48   :  { %496 = vmatpush1.bf16.msra.mxu1 %v1287_v48 }
  0x49   :  { %497 = vmatprep.subr.bf16.mxu1 %v1288_v49 }
  0x4c   :  { %498 = vmatpush1.bf16.msra.mxu1 %v1290_v50 }
  0x4d   :  { %499 = vmatprep.subr.bf16.mxu1 %v1291_v51  ;;  %v1312_v51 = vld [vmem:[#allocation5] ss:$8 sps:$4 sm:$0xff]  }
  0x50   :  { %500 = vmatpush1.bf16.msra.mxu1 %v1293_v52  ;;  %v1314_v52 = vld [vmem:[#allocation5 + $0x4] ss:$8 sps:$4 sm:$0xff]  }
  0x51   :  { %501 = vmatprep.subr.bf16.mxu1 %v1294_v53  ;;  %v1317_v53 = vld [vmem:[#allocation5 + $0x14] ss:$8 sps:$4 sm:$0xff]   ;;  %810 = vmatprep.subr.bf16.mxu0 %v1314_v52 }
  0x52   :  { %811 = vmatpush1.bf16.msra.mxu0 %v1312_v51 }
  0x53   :  { %812 = vmatprep.subr.bf16.mxu0 %v1317_v53 }
  0x54   :  { %502 = vmatpush1.bf16.msra.mxu1 %v1296_v54  ;;  %v1315_v54 = vld [vmem:[#allocation5 + $0x10] ss:$8 sps:$4 sm:$0xff]  }
  0x55   :  { %503 = vmatprep.subr.bf16.mxu1 %v1297_v55  ;;  %v1320_v55 = vld [vmem:[#allocation5 + $0x24] ss:$8 sps:$4 sm:$0xff]  }
  0x56   :  { %813 = vmatpush1.bf16.msra.mxu0 %v1315_v54  ;;  %v524_v54 = vld [vmem:[%s1797_s7] sm:$0x3] }
  0x57   :  { %814 = vmatprep.subr.bf16.mxu0 %v1320_v55  ;;  %v525_v55 = vld [vmem:[%s1798_s8] sm:$0x3] }
  0x58   :  { %504 = vmatpush1.bf16.msra.mxu1 %v1299_v56  ;;  %v1318_v56 = vld [vmem:[#allocation5 + $0x20] ss:$8 sps:$4 sm:$0xff]  }
  0x59   :  { %505 = vmatprep.subr.bf16.mxu1 %v1300_v57  ;;  %v1323_v57 = vld [vmem:[#allocation5 + $0x34] ss:$8 sps:$4 sm:$0xff]  }
  0x5a   :  { %815 = vmatpush1.bf16.msra.mxu0 %v1318_v56 }
  0x5b   :  { %816 = vmatprep.subr.bf16.mxu0 %v1323_v57 }
  0x5c   :  { %506 = vmatpush1.bf16.msra.mxu1 %v1302_v58  ;;  %v1321_v58 = vld [vmem:[#allocation5 + $0x30] ss:$8 sps:$4 sm:$0xff]  }
  0x5d   :  { %507 = vmatprep.subr.bf16.mxu1 %v1303_v59  ;;  %v1326_v59 = vld [vmem:[#allocation5 + $0x44] ss:$8 sps:$4 sm:$0xff]  }
  0x5e   :  { %817 = vmatpush1.bf16.msra.mxu0 %v1321_v58  ;;  %v566_v58 = vrot.slane %v524_v54, %v1603_v27 }
  0x5f   :  { %818 = vmatprep.subr.bf16.mxu0 %v1326_v59  ;;  %v570_v59 = vrot.slane %v524_v54, %v1608_v29  ;;  %v1369_v54 = vld [vmem:[%s1803_s13 + $0x20] sm:$0xff]  }
  0x60   :  { %508 = vmatpush1.bf16.msra.mxu1 %v1305_v60  ;;  %v1324_v60 = vld [vmem:[#allocation5 + $0x40] ss:$8 sps:$4 sm:$0xff]  }
  0x61   :  { %509 = vmatprep.subr.bf16.mxu1 %v1306_v61  ;;  %v1329_v61 = vld [vmem:[#allocation5 + $0x54] ss:$8 sps:$4 sm:$0xff]  }
  0x62   :  { %819 = vmatpush1.bf16.msra.mxu0 %v1324_v60 }
  0x63   :  { %820 = vmatprep.subr.bf16.mxu0 %v1329_v61  ;;  %v581_v61 = vrot.slane %v525_v55, %v1603_v27 }
  0x64   :  { %510 = vmatpush1.bf16.msra.mxu1 %v1308_v62  ;;  %v1327_v62 = vld [vmem:[#allocation5 + $0x50] ss:$8 sps:$4 sm:$0xff]  }
  0x65   :  { %511 = vmatprep.subr.bf16.mxu1 %v1309_v63  ;;  %v1332_v63 = vld [vmem:[#allocation5 + $0x64] ss:$8 sps:$4 sm:$0xff]  }
  0x66   :  { %821 = vmatpush1.bf16.msra.mxu0 %v1327_v62  ;;  %v585_v62 = vrot.slane %v525_v55, %v1608_v29  ;;  %v1370_v55 = vld [vmem:[%s1803_s13 + $0x68] sm:$0xff]  }
  0x67   :  { %822 = vmatprep.subr.bf16.mxu0 %v1332_v63 }
  0x68   :  { %512 = vmatpush1.bf16.msra.mxu1 %v1311_v0  ;;  %v1330_v0 = vld [vmem:[#allocation5 + $0x60] ss:$8 sps:$4 sm:$0xff]  }
  0x6a   :  { %823 = vmatpush1.bf16.msra.mxu0 %v1330_v0 }
 0x10a   :  { %v185_v32 = vpop.f32.mrb[0].mxu0 }
 0x10b   :  { %v1612_v33 = vadd.f32 %v185_v32, %v95_v30  ;;  %v187_v34 = vpop.f32.mrb[1].mxu0 }
 0x10c   :  { %v1614_v35 = vadd.f32 %v187_v34, %v99_v31  ;;  %v189_v36 = vpop.f32.mrb[2].mxu0 }
 0x10d   :  { %v1616_v37 = vadd.f32 %v189_v36, %v95_v30  ;;  %v191_v38 = vpop.f32.mrb[3].mxu0  ;;  %v205_v39 = vmul.f32 %v1612_v33, %v1612_v33 }
 0x10e   :  { %v1620_v40 = vadd.f32 %v191_v38, %v99_v31  ;;  %v196_v41 = vadd.f32 %v1614_v35, %v1612_v33  ;;  %v206_v42 = vmul.f32 %v1614_v35, %v1614_v35 }
 0x10f   :  { %v207_v44 = vmul.f32 %v1616_v37, %v1616_v37 }
 0x110   :  { %197 = vadd.xlane.f32.xlu0 %v196_v41  ;;  %v209_v43 = vadd.f32 %v206_v42, %v205_v39  ;;  %v208_v45 = vmul.f32 %v1620_v40, %v1620_v40  ;;  %v199_v46 = vadd.f32 %v1620_v40, %v1616_v37 }
 0x112   :  { %210 = vadd.xlane.f32.xlu1 %v209_v43  ;;  %v212_v47 = vadd.f32 %v208_v45, %v207_v44 }
 0x114   :  { %200 = vadd.xlane.f32.xlu0 %v199_v46 }
 0x116   :  { %213 = vadd.xlane.f32.xlu1 %v212_v47 }
 0x19d   :  { %v198_v1 = vpop.xlane.xlu0 %197 }
 0x19e   :  { %v203_v2 = vmul.f32 0.00390625, %v198_v1  ;;  %v1335_v1 = vld [vmem:[#allocation5 + $0x74] ss:$8 sps:$4 sm:$0xff]  }
 0x19f   :  { %v211_v3 = vpop.xlane.xlu1 %210  ;;  %824 = vmatprep.subr.bf16.mxu0 %v1335_v1 }
 0x1a0   :  { %v215_v4 = vmul.f32 0.00390625, %v211_v3  ;;  %v217_v5 = vmul.f32 %v203_v2, %v203_v2  ;;  %v225_v16 = vsub.f32 %v1612_v33, %v203_v2  ;;  %v226_v17 = vsub.f32 %v1614_v35, %v203_v2  ;;  %v1333_v2 = vld [vmem:[#allocation5 + $0x70] ss:$8 sps:$4 sm:$0xff]   ;;  %v309_v3 = vld [vmem:[%s1796_s6] sm:$0x3] }
 0x1a1   :  { %v201_v6 = vpop.xlane.xlu0 %200  ;;  %825 = vmatpush1.bf16.msra.mxu0 %v1333_v2 }
 0x1a2   :  { %v219_v7 = vsub.f32 %v215_v4, %v217_v5  ;;  %v204_v8 = vmul.f32 0.00390625, %v201_v6  ;;  %v314_v4 = vrot.slane %v309_v3, %v1603_v27  ;;  %v318_v5 = vrot.slane %v309_v3, %v1608_v29 }
 0x1a3   :  { %v214_v9 = vpop.xlane.xlu1 %213 }
 0x1a4   :  { %v221_v10 = vadd.f32 1e-05, %v219_v7  ;;  %v216_v11 = vmul.f32 0.00390625, %v214_v9  ;;  %v218_v12 = vmul.f32 %v204_v8, %v204_v8  ;;  %v227_v30 = vsub.f32 %v1616_v37, %v204_v8 }
 0x1a5   :  { %v228_v31 = vsub.f32 %v1620_v40, %v204_v8 }
 0x1a6   :  { %1376 = vrsqrt.f32 %v221_v10  ;;  %v220_v13 = vsub.f32 %v216_v11, %v218_v12 }
 0x1a8   :  { %v222_v14 = vadd.f32 1e-05, %v220_v13 }
 0x1aa   :  { %1378 = vrsqrt.f32 %v222_v14 }
 0x1b0   :  { %v1377_v21 = vpop.eup %1376 }
 0x1b1   :  { %v230_v22 = vmul.f32 %v1377_v21, %v226_v17  ;;  %v229_v23 = vmul.f32 %v1377_v21, %v225_v16 }
 0x1b3   :  { %v245_v26 = vmul.f32 %v241_v20, %v230_v22  ;;  %v244_v28 = vmul.f32 %v237_v19, %v229_v23  ;;  %v1338_v22 = vld [vmem:[#allocation5 + $0x84] ss:$8 sps:$4 sm:$0xff]   ;;  %v1336_v23 = vld [vmem:[#allocation5 + $0x80] ss:$8 sps:$4 sm:$0xff]  }
 0x1b4   :  { %v1379_v32 = vpop.eup %1378  ;;  %826 = vmatprep.subr.bf16.mxu0 %v1338_v22 }
 0x1b5   :  { %v232_v33 = vmul.f32 %v1379_v32, %v228_v31  ;;  %v260_v34 = vadd.f32 %v256_v25, %v245_v26  ;;  %v231_v35 = vmul.f32 %v1379_v32, %v227_v30  ;;  %v259_v36 = vadd.f32 %v252_v24, %v244_v28  ;;  %827 = vmatpush1.bf16.msra.mxu0 %v1336_v23  ;;  %v1344_v26 = vld [vmem:[#allocation5 + $0xa4] ss:$8 sps:$4 sm:$0xff]   ;;  %v1342_v28 = vld [vmem:[#allocation5 + $0xa0] ss:$8 sps:$4 sm:$0xff]   ;;  %v1347_v30 = vld [vmem:[#allocation5 + $0xb4] ss:$8 sps:$4 sm:$0xff]  }
 0x1b6   :  { %v1345_v31 = vld [vmem:[#allocation5 + $0xb0] ss:$8 sps:$4 sm:$0xff]   ;;  %v1350_v32 = vld [vmem:[#allocation5 + $0xc4] ss:$8 sps:$4 sm:$0xff]  }
 0x1b7   :  { %v247_v38 = vmul.f32 %v241_v20, %v232_v33  ;;  %v246_v39 = vmul.f32 %v237_v19, %v231_v35  ;;  %v268_v42 = vmul.f32 0.01, %v260_v34  ;;  %v267_v44 = vmul.f32 0.01, %v259_v36  ;;  %v1348_v33 = vld [vmem:[#allocation5 + $0xc0] ss:$8 sps:$4 sm:$0xff]  }
 0x1b8   :  { %vm264_vm1 = vcmp.ge.f32.partialorder %v260_v34, 0.0  ;;  %vm263_vm2 = vcmp.ge.f32.partialorder %v259_v36, 0.0  ;;  %v1351_v35 = vld [vmem:[#allocation5 + $0xd0] ss:$8 sps:$4 sm:$0xff]  }
 0x1b9   :  { %v262_v41 = vadd.f32 %v256_v25, %v247_v38  ;;  %v261_v43 = vadd.f32 %v252_v24, %v246_v39  ;;  %v272_v37 = vsel %vm264_vm1, %v260_v34, %v268_v42  ;;  %v271_v40 = vsel %vm263_vm2, %v259_v36, %v267_v44  ;;  %v1341_v24 = vld [vmem:[#allocation5 + $0x94] ss:$8 sps:$4 sm:$0xff]   ;;  %v1339_v25 = vld [vmem:[#allocation5 + $0x90] ss:$8 sps:$4 sm:$0xff]   ;;  %v1356_v36 = vld [vmem:[#allocation5 + $0xe4] ss:$8 sps:$4 sm:$0xff]  }
 0x1ba   :  { %828 = vmatprep.subr.bf16.mxu0 %v1341_v24  ;;  %v1353_v34 = vld [vmem:[#allocation5 + $0xd4] ss:$8 sps:$4 sm:$0xff]   ;;  %v1354_v38 = vld [vmem:[#allocation5 + $0xe0] ss:$8 sps:$4 sm:$0xff]  }
 0x1bb   :  { %vm266_vm3 = vcmp.ge.f32.partialorder %v262_v41, 0.0  ;;  %v270_v45 = vmul.f32 0.01, %v262_v41  ;;  %vm265_vm4 = vcmp.ge.f32.partialorder %v261_v43, 0.0  ;;  %v269_v46 = vmul.f32 0.01, %v261_v43  ;;  %829 = vmatpush1.bf16.msra.mxu0 %v1339_v25 }
 0x1bc   :  { %830 = vmatprep.subr.bf16.mxu0 %v1344_v26  ;;  %v1359_v39 = vld [vmem:[#allocation5 + $0xf4] ss:$8 sps:$4 sm:$0xff]   ;;  %v638_v24 = vld [vmem:[%s1800_s10] sm:$0x3] }
 0x1bd   :  { %v274_v47 = vsel %vm266_vm3, %v262_v41, %v270_v45  ;;  %v273_v48 = vsel %vm265_vm4, %v261_v43, %v269_v46  ;;  %v1357_v41 = vld [vmem:[#allocation5 + $0xf0] ss:$8 sps:$4 sm:$0xff]   ;;  %v643_v25 = vrot.slane %v638_v24, %v1603_v27  ;;  %v647_v26 = vrot.slane %v638_v24, %v1608_v29 }
 0x1be   :  { %v276_v49 = vpack.c.bf16 %v274_v47, %v272_v37  ;;  %v275_v50 = vpack.c.bf16 %v273_v48, %v271_v40 }
 0x1bf   :  { %831 = vmatpush1.bf16.msra.mxu0 %v1342_v28 }
 0x1c0   :  { %513 = vmatprep.mubr.bf16.mxu1 %v276_v49  ;;  %832 = vmatprep.subr.bf16.mxu0 %v1347_v30 }
 0x1c1   :  { %514 = vmatmul.mubr.bf16.vlgmr.msra.gmra.mrb[0].mxu1 %v275_v50 }
 0x1c3   :  { %833 = vmatpush1.bf16.msra.mxu0 %v1345_v31 }
 0x1c4   :  { %834 = vmatprep.subr.bf16.mxu0 %v1350_v32 }
 0x1c7   :  { %835 = vmatpush1.bf16.msra.mxu0 %v1348_v33 }
 0x1c8   :  { %836 = vmatprep.subr.bf16.mxu0 %v1353_v34 }
 0x1cb   :  { %837 = vmatpush1.bf16.msra.mxu0 %v1351_v35 }
 0x1cc   :  { %838 = vmatprep.subr.bf16.mxu0 %v1356_v36 }
 0x1cf   :  { %839 = vmatpush1.bf16.msra.mxu0 %v1354_v38 }
 0x1d0   :  { %840 = vmatprep.subr.bf16.mxu0 %v1359_v39 }
 0x1d3   :  { %841 = vmatpush1.bf16.msra.mxu0 %v1357_v41 }
 0x294   :  { %v515_v6 = vpop.f32.mrb[0].mxu1 }
 0x295   :  { %v1651_v7 = vadd.f32 %v515_v6, %v314_v4  ;;  %v517_v8 = vpop.f32.mrb[1].mxu1 }
 0x296   :  { %v1653_v9 = vadd.f32 %v517_v8, %v318_v5  ;;  %v519_v10 = vpop.f32.mrb[2].mxu1 }
 0x297   :  { %v1655_v11 = vadd.f32 %v519_v10, %v314_v4  ;;  %v521_v12 = vpop.f32.mrb[3].mxu1  ;;  %v534_v15 = vmul.f32 %v1651_v7, %v1651_v7 }
 0x298   :  { %v1657_v13 = vadd.f32 %v521_v12, %v318_v5  ;;  %v526_v14 = vadd.f32 %v1653_v9, %v1651_v7  ;;  %v535_v16 = vmul.f32 %v1653_v9, %v1653_v9 }
 0x299   :  { %v536_v18 = vmul.f32 %v1655_v11, %v1655_v11 }
 0x29a   :  { %527 = vadd.xlane.f32.xlu0 %v526_v14  ;;  %v529_v17 = vadd.f32 %v1657_v13, %v1655_v11  ;;  %v537_v19 = vmul.f32 %v1657_v13, %v1657_v13  ;;  %v538_v20 = vadd.f32 %v535_v16, %v534_v15 }
 0x29c   :  { %530 = vadd.xlane.f32.xlu1 %v529_v17  ;;  %v541_v21 = vadd.f32 %v537_v19, %v536_v18 }
 0x29e   :  { %539 = vadd.xlane.f32.xlu0 %v538_v20 }
 0x2a0   :  { %542 = vadd.xlane.f32.xlu1 %v541_v21 }
 0x327   :  { %v528_v42 = vpop.xlane.xlu0 %527 }
 0x328   :  { %v532_v43 = vmul.f32 0.00390625, %v528_v42 }
 0x329   :  { %v531_v44 = vpop.xlane.xlu1 %530 }
 0x32a   :  { %v533_v45 = vmul.f32 0.00390625, %v531_v44  ;;  %v546_v37 = vmul.f32 %v532_v43, %v532_v43  ;;  %v554_v56 = vsub.f32 %v1651_v7, %v532_v43  ;;  %v555_v57 = vsub.f32 %v1653_v9, %v532_v43 }
 0x32b   :  { %v540_v46 = vpop.xlane.xlu0 %539 }
 0x32c   :  { %v544_v47 = vmul.f32 0.00390625, %v540_v46  ;;  %v547_v49 = vmul.f32 %v533_v45, %v533_v45  ;;  %v556_v63 = vsub.f32 %v1655_v11, %v533_v45  ;;  %v557_v0 = vsub.f32 %v1657_v13, %v533_v45 }
 0x32d   :  { %v543_v40 = vpop.xlane.xlu1 %542 }
 0x32e   :  { %v548_v48 = vsub.f32 %v544_v47, %v546_v37  ;;  %v545_v50 = vmul.f32 0.00390625, %v543_v40  ;;  %v1360_v37 = vld [vmem:[%s1803_s13 + $0x40] sm:$0xff]   ;;  %v1362_v40 = vld [vmem:[%s1803_s13 + $0x48] sm:$0xff]  }
 0x32f   :  { %v1361_v47 = vld [vmem:[%s1803_s13] sm:$0xff]   ;;  %1223 = vmatprep.subr.bf16.mxu1 %v1360_v37 }
 0x330   :  { %v550_v51 = vadd.f32 1e-05, %v548_v48  ;;  %v549_v52 = vsub.f32 %v545_v50, %v547_v49  ;;  %1224 = vmatpush3.bf16.msra.mxu1 %v1361_v47  ;;  %v1363_v48 = vld [vmem:[%s1803_s13 + $0x8] sm:$0xff]   ;;  %v1364_v49 = vld [vmem:[%s1803_s13 + $0x50] sm:$0xff]   ;;  %v1206_v47 = vld [vmem:[%s1804_s14] ss:$0 sm:$0xff] }
 0x331   :  { %1225 = vmatprep.subr.bf16.mxu1 %v1362_v40  ;;  %v1365_v50 = vld [vmem:[%s1803_s13 + $0x10] sm:$0xff]  }
 0x332   :  { %1380 = vrsqrt.f32 %v550_v51  ;;  %v551_v53 = vadd.f32 1e-05, %v549_v52  ;;  %v1366_v51 = vld [vmem:[%s1803_s13 + $0x58] sm:$0xff]  }
 0x333   :  { %v1367_v52 = vld [vmem:[%s1803_s13 + $0x18] sm:$0xff]  }
 0x334   :  { %1382 = vrsqrt.f32 %v551_v53  ;;  %1226 = vmatpush3.bf16.msra.mxu1 %v1363_v48  ;;  %v1368_v53 = vld [vmem:[%s1803_s13 + $0x60] sm:$0xff]  }
 0x335   :  { %1227 = vmatprep.subr.bf16.mxu1 %v1364_v49 }
 0x338   :  { %1228 = vmatpush3.bf16.msra.mxu1 %v1365_v50 }
 0x339   :  { %1229 = vmatprep.subr.bf16.mxu1 %v1366_v51 }
 0x33c   :  { %v1381_v60 = vpop.eup %1380  ;;  %1230 = vmatpush3.bf16.msra.mxu1 %v1367_v52 }
 0x33d   :  { %v558_v1 = vmul.f32 %v1381_v60, %v554_v56  ;;  %v559_v2 = vmul.f32 %v1381_v60, %v555_v57  ;;  %1231 = vmatprep.subr.bf16.mxu1 %v1368_v53  ;;  %v1371_v56 = vld [vmem:[%s1803_s13 + $0x28] sm:$0xff]   ;;  %v1372_v57 = vld [vmem:[%s1803_s13 + $0x70] sm:$0xff]   ;;  %v1375_v60 = vld [vmem:[%s1803_s13 + $0x38] sm:$0xff]  }
 0x33e   :  { %v1383_v3 = vpop.eup %1382 }
 0x33f   :  { %v560_v4 = vmul.f32 %v1383_v3, %v556_v63  ;;  %v561_v5 = vmul.f32 %v1383_v3, %v557_v0  ;;  %v574_v6 = vmul.f32 %v570_v59, %v559_v2  ;;  %v573_v7 = vmul.f32 %v566_v58, %v558_v1 }
 0x340   :  { %1232 = vmatpush3.bf16.msra.mxu1 %v1369_v54 }
 0x341   :  { %v576_v8 = vmul.f32 %v570_v59, %v561_v5  ;;  %v589_v9 = vadd.f32 %v585_v62, %v574_v6  ;;  %v575_v10 = vmul.f32 %v566_v58, %v560_v4  ;;  %v588_v12 = vadd.f32 %v581_v61, %v573_v7  ;;  %1233 = vmatprep.subr.bf16.mxu1 %v1370_v55  ;;  %v1373_v58 = vld [vmem:[%s1803_s13 + $0x30] sm:$0xff]   ;;  %v1374_v59 = vld [vmem:[%s1803_s13 + $0x78] sm:$0xff]  }
 0x343   :  { %v591_v14 = vadd.f32 %v585_v62, %v576_v8  ;;  %v597_v15 = vmul.f32 0.01, %v589_v9  ;;  %v590_v16 = vadd.f32 %v581_v61, %v575_v10  ;;  %vm593_vm5 = vcmp.ge.f32.partialorder %v589_v9, 0.0 }
 0x344   :  { %v596_v17 = vmul.f32 0.01, %v588_v12  ;;  %vm592_vm7 = vcmp.ge.f32.partialorder %v588_v12, 0.0  ;;  %1234 = vmatpush3.bf16.msra.mxu1 %v1371_v56 }
 0x345   :  { %vm595_vm6 = vcmp.ge.f32.partialorder %v591_v14, 0.0  ;;  %v599_v11 = vmul.f32 0.01, %v591_v14  ;;  %vm594_vm8 = vcmp.ge.f32.partialorder %v590_v16, 0.0  ;;  %v598_v13 = vmul.f32 0.01, %v590_v16  ;;  %1235 = vmatprep.subr.bf16.mxu1 %v1372_v57 }
 0x346   :  { %v601_v18 = vsel %vm593_vm5, %v589_v9, %v597_v15  ;;  %v600_v21 = vsel %vm592_vm7, %v588_v12, %v596_v17  ;;  %v853_v12 = vld [vmem:[%s1801_s11] sm:$0x3] }
 0x347   :  { %v603_v19 = vsel %vm595_vm6, %v591_v14, %v599_v11  ;;  %v602_v22 = vsel %vm594_vm8, %v590_v16, %v598_v13  ;;  %v854_v14 = vld [vmem:[%s1802_s12] sm:$0x3]  ;;  %v895_v17 = vrot.slane %v853_v12, %v1603_v27  ;;  %v899_v11 = vrot.slane %v853_v12, %v1608_v29 }
 0x348   :  { %v605_v20 = vpack.c.bf16 %v603_v19, %v601_v18  ;;  %v604_v23 = vpack.c.bf16 %v602_v22, %v600_v21  ;;  %1236 = vmatpush3.bf16.msra.mxu1 %v1373_v58  ;;  %v910_v18 = vrot.slane %v854_v14, %v1603_v27  ;;  %v914_v19 = vrot.slane %v854_v14, %v1608_v29 }
 0x349   :  { %1237 = vmatprep.subr.bf16.mxu1 %v1374_v59 }
 0x34a   :  { %842 = vmatprep.mubr.bf16.mxu0 %v605_v20 }
 0x34b   :  { %843 = vmatmul.mubr.bf16.vlgmr.msra.gmra.mrb[4].mxu0 %v604_v23 }
 0x34c   :  { %1238 = vmatpush3.bf16.msra.mxu1 %v1375_v60 }
 0x41e   :  { %v844_v28 = vpop.f32.mrb[4].mxu0 }
 0x41f   :  { %v1690_v30 = vadd.f32 %v844_v28, %v643_v25  ;;  %v846_v31 = vpop.f32.mrb[5].mxu0 }
 0x420   :  { %v1692_v32 = vadd.f32 %v846_v31, %v647_v26  ;;  %v848_v33 = vpop.f32.mrb[6].mxu0 }
 0x421   :  { %v1694_v34 = vadd.f32 %v848_v33, %v643_v25  ;;  %v850_v35 = vpop.f32.mrb[7].mxu0  ;;  %v863_v39 = vmul.f32 %v1690_v30, %v1690_v30 }
 0x422   :  { %v1696_v36 = vadd.f32 %v850_v35, %v647_v26  ;;  %v855_v38 = vadd.f32 %v1692_v32, %v1690_v30  ;;  %v864_v41 = vmul.f32 %v1692_v32, %v1692_v32 }
 0x423   :  { %v865_v43 = vmul.f32 %v1694_v34, %v1694_v34 }
 0x424   :  { %856 = vadd.xlane.f32.xlu0 %v855_v38  ;;  %v858_v42 = vadd.f32 %v1696_v36, %v1694_v34  ;;  %v866_v44 = vmul.f32 %v1696_v36, %v1696_v36  ;;  %v867_v45 = vadd.f32 %v864_v41, %v863_v39 }
 0x426   :  { %859 = vadd.xlane.f32.xlu1 %v858_v42  ;;  %v870_v46 = vadd.f32 %v866_v44, %v865_v43 }
 0x428   :  { %868 = vadd.xlane.f32.xlu0 %v867_v45 }
 0x42a   :  { %871 = vadd.xlane.f32.xlu1 %v870_v46 }
 0x4b1   :  { %v857_v61 = vpop.xlane.xlu0 %856 }
 0x4b2   :  { %v861_v62 = vmul.f32 0.00390625, %v857_v61 }
 0x4b3   :  { %v860_v63 = vpop.xlane.xlu1 %859 }
 0x4b4   :  { %v862_v0 = vmul.f32 0.00390625, %v860_v63  ;;  %v875_v2 = vmul.f32 %v861_v62, %v861_v62  ;;  %v883_v15 = vsub.f32 %v1690_v30, %v861_v62  ;;  %v884_v16 = vsub.f32 %v1692_v32, %v861_v62 }
 0x4b5   :  { %v869_v1 = vpop.xlane.xlu0 %868 }
 0x4b6   :  { %v873_v3 = vmul.f32 0.00390625, %v869_v1  ;;  %v876_v6 = vmul.f32 %v862_v0, %v862_v0  ;;  %v885_v20 = vsub.f32 %v1694_v34, %v862_v0  ;;  %v886_v21 = vsub.f32 %v1696_v36, %v862_v0 }
 0x4b7   :  { %v872_v4 = vpop.xlane.xlu1 %871 }
 0x4b8   :  { %v877_v5 = vsub.f32 %v873_v3, %v875_v2  ;;  %v874_v7 = vmul.f32 0.00390625, %v872_v4 }
 0x4ba   :  { %v879_v8 = vadd.f32 1e-05, %v877_v5  ;;  %v878_v9 = vsub.f32 %v874_v7, %v876_v6 }
 0x4bc   :  { %1384 = vrsqrt.f32 %v879_v8  ;;  %v880_v10 = vadd.f32 1e-05, %v878_v9 }
 0x4be   :  { %1386 = vrsqrt.f32 %v880_v10 }
 0x4c6   :  { %v1385_v13 = vpop.eup %1384 }
 0x4c7   :  { %v887_v22 = vmul.f32 %v1385_v13, %v883_v15  ;;  %v888_v23 = vmul.f32 %v1385_v13, %v884_v16 }
 0x4c8   :  { %v1387_v24 = vpop.eup %1386 }
 0x4c9   :  { %v889_v25 = vmul.f32 %v1387_v24, %v885_v20  ;;  %v890_v26 = vmul.f32 %v1387_v24, %v886_v21  ;;  %v903_v28 = vmul.f32 %v899_v11, %v888_v23  ;;  %v902_v30 = vmul.f32 %v895_v17, %v887_v22 }
 0x4cb   :  { %v905_v31 = vmul.f32 %v899_v11, %v890_v26  ;;  %v918_v32 = vadd.f32 %v914_v19, %v903_v28  ;;  %v904_v33 = vmul.f32 %v895_v17, %v889_v25  ;;  %v917_v35 = vadd.f32 %v910_v18, %v902_v30 }
 0x4cd   :  { %v920_v38 = vadd.f32 %v914_v19, %v905_v31  ;;  %v926_v39 = vmul.f32 0.01, %v918_v32  ;;  %v919_v27 = vadd.f32 %v910_v18, %v904_v33  ;;  %vm922_vm9 = vcmp.ge.f32.partialorder %v918_v32, 0.0 }
 0x4ce   :  { %v925_v29 = vmul.f32 0.01, %v917_v35  ;;  %vm921_vm11 = vcmp.ge.f32.partialorder %v917_v35, 0.0 }
 0x4cf   :  { %vm924_vm10 = vcmp.ge.f32.partialorder %v920_v38, 0.0  ;;  %v928_v34 = vmul.f32 0.01, %v920_v38  ;;  %vm923_vm12 = vcmp.ge.f32.partialorder %v919_v27, 0.0  ;;  %v927_v36 = vmul.f32 0.01, %v919_v27 }
 0x4d0   :  { %v930_v41 = vsel %vm922_vm9, %v918_v32, %v926_v39  ;;  %v929_v44 = vsel %vm921_vm11, %v917_v35, %v925_v29 }
 0x4d1   :  { %v932_v42 = vsel %vm924_vm10, %v920_v38, %v928_v34  ;;  %v931_v45 = vsel %vm923_vm12, %v919_v27, %v927_v36 }
 0x4d2   :  { %v934_v43 = vpack.c.bf16 %v932_v42, %v930_v41  ;;  %v933_v46 = vpack.c.bf16 %v931_v45, %v929_v44 }
 0x4d4   :  { %1102 = vmatprep.mubr.bf16.mxu1 %v934_v43 }
 0x4d5   :  { %1103 = vmatmul.mubr.bf16.vlgmr.msra.gmra.mrb[4].mxu1 %v933_v46 }
 0x5a8   :  { %v1239_v37 = vpop.f32.mrb[4].mxu1 }
 0x5a9   :  { %v1240_v40 = vpop.f32.mrb[5].mxu1 }
 0x5aa   :  { %v1241_v48 = vadd.f32 %v1240_v40, %v1239_v37  ;;  %v1242_v49 = vpop.f32.mrb[6].mxu1 }
 0x5ab   :  { %v1243_v50 = vpop.f32.mrb[7].mxu1 }
 0x5ac   :  { %v1105_v51 = vadd.f32 %v1241_v48, %v1206_v47  ;;  %v1244_v52 = vadd.f32 %v1243_v50, %v1242_v49 }
 0x5ae   :  { %v1108_v53 = vadd.f32 %v1244_v52, %v1206_v47  ;;  %1112 = vst.msk [vmem:[#allocation7] sm:$0xff] %vm1111_vm13, %v1105_v51 }
 0x5b0   :  { %1113 = vst.msk [vmem:[#allocation7 + $0x8] sm:$0xff] %vm1111_vm13, %v1108_v53 }
 0x5b1   :  { %1443 = shalt.err (!%p1440_p6)
}
 0x5b2   :  { %s1444_s22 = scalar_lea.hbm %s1805_s15, 256 }
 0x5b3   :  { %p1445_p7 = scmp.ne.s32.totalorder %s1805_s15, %s1444_s22  ;;  %p1448_p8 = scmp.lt.u32.totalorder %s1444_s22, %s1805_s15 }
 0x5b5   :  { %p1450_p9 = pnand %p1448_p8, %p1445_p7 }
 0x5b7   :  { %1453 = shalt.err (!%p1450_p9)
}
 0x5b8   :  { %1125 = dma.vmem_to_hbm [thread:$0]  %s1120_s2, 256, %s1805_s15, [#allocation4], %s1461_s28, %s1461_s28, %s1462_s29  }
 0x5b9   :  { %1458 = dma.done.wait [#allocation4], 256  }
 0x5ba   :  { %1459 = vsyncadd [#allocation4], 4294967040 }
 0x5bb   :  { %1129 = vsyncpa [#allocation3], 1 }
 0x5bc   :  { %1130 = vsyncpa [#allocation6], 1 }
 0x5bd   :  { %1131 = vsyncpa [#allocation4], 1 }

</bundles_post_ra>
